<compile_context>
chip_gen: v7x
topology: tpu7x:2x2x1
jax: 0.10.0
libtpu: 0.0.40
codegen_flags: <defaults>
</compile_context>

<pallas_src>
import jax
import jax.numpy as jnp
from jax import lax
from jax.experimental import pallas as pl
from jax.experimental.pallas import tpu as pltpu


def _round_up(a, b):
    return (a + b - 1) // b * b


def _cdiv(a, b):
    return (a + b - 1) // b


def _divisors(n):
    ds = []
    i = 1
    while i * i <= n:
        if n % i == 0:
            ds.append(i)
            if i != n // i:
                ds.append(n // i)
        i += 1
    return sorted(ds)


def _sublane_multiple(dtype):
    return {4: 8, 2: 16, 1: 32}.get(jnp.dtype(dtype).itemsize, 8)


def _vmem_budget():
    """(scoped_vmem_limit_bytes, input_block_target_bytes) for this chip."""
    vmem_cap = 64 << 20
    try:
        info = pltpu.get_tpu_info()
        vmem_cap = int(getattr(info, "vmem_capacity_bytes", vmem_cap))
    except Exception:
        pass
    # never request more than half the physical VMEM; cap at 64 MiB
    scoped = min(max(vmem_cap // 2, 16 << 20), 64 << 20)
    # 2x double-buffered input + 2x output (+ slack) must fit inside `scoped`
    blk_target = min(int(scoped * 0.3), 16 << 20)
    try:
        kind = jax.devices()[0].device_kind.lower()
        if "v5 lite" in kind or "v5e" in kind or "v5lite" in kind:
            # v5e: ~0.8 TB/s HBM -> 4-6 MiB tiles already sit near the roofline
            blk_target = min(blk_target, 6 << 20)
    except Exception:
        pass
    return scoped, blk_target


def _choose_groups(total_groups, k, wc, wo, itemsize, blk_target):
    """Pick G | total_groups so the packed output row width G*wo is lane-dense."""
    max_groups = 256          # bounds in-kernel unroll length
    max_lout = 2048
    cands = [d for d in _divisors(total_groups)
             if d <= max_groups and d * wo <= max_lout]
    # prefer row widths that still allow >= 8 rows per input block
    roomy = [d for d in cands if d * k * wc * itemsize * 8 <= blk_target]
    if roomy:
        cands = roomy
    if not cands:
        cands = [1]

    def key(d):
        lout = d * wo
        if lout >= 128 and lout % 128 == 0:
            cls = 0          # lane-dense and 128-aligned: best
        elif lout >= 128:
            cls = 1
        else:
            cls = 2
        # class 0/1: smallest G that achieves it; class 2: widest lout reachable
        return (cls, d if cls < 2 else -lout)

    return min(cands, key=key)


def _make_maxpool_kernel(k, groups, wc, wo):
    """Kernel over rows of shape (tile_m, groups*k*wc) -> (tile_m, groups*wo)."""

    def kernel(x_ref, o_ref):
        cdtype = x_ref.dtype
        # Exact 0/1 selection matrices for the W-direction compaction, built
        # once per grid step from iota comparisons (VPU filler hidden under
        # the HBM DMA):  sel_j[w, c] = 1  iff  w == c*k + j.
        rows = lax.broadcasted_iota(jnp.int32, (wc, wo), 0)
        cols = lax.broadcasted_iota(jnp.int32, (wc, wo), 1)
        sels = [(rows == cols * k + j).astype(cdtype) for j in range(k)]

        for g in range(groups):
            base = g * k * wc
            # H-direction: max over the k image rows of this group (static lane slices)
            r = x_ref[:, base:base + wc]
            for j in range(1, k):
                r = jnp.maximum(r, x_ref[:, base + j * wc: base + (j + 1) * wc])
            # W-direction + lane compaction: max of k exact selection matmuls
            # (0/1 weights, a single nonzero per output column -> bit-exact).
            og = None
            for j in range(k):
                p = jnp.dot(r, sels[j], preferred_element_type=jnp.float32)
                og = p if og is None else jnp.maximum(og, p)
            o_ref[:, g * wo:(g + 1) * wo] = og.astype(o_ref.dtype)

    return kernel


def _reference(x, k=2):
    """Pure-JAX reference: floor-mode max pooling (matches nn.MaxPool2d(k, k))."""
    if jnp.issubdtype(x.dtype, jnp.floating):
        init = jnp.array(-jnp.inf, dtype=x.dtype)
    else:
        init = jnp.array(jnp.iinfo(x.dtype).min, dtype=x.dtype)
    return lax.reduce_window(
        x, init, lax.max,
        window_dimensions=(1, 1, k, k),
        window_strides=(1, 1, k, k),
        padding="VALID",
    )


def max_pool_2d(x, k=2):
    """nn.MaxPool2d(kernel_size=k, stride=k) on an NCHW tensor (floor mode)."""
    n, c, h, w = x.shape
    ho, wo = h // k, w // k
    assert ho > 0 and wo > 0, "input smaller than pooling window"

    if not jnp.issubdtype(x.dtype, jnp.floating):
        # TODO(synk): integer inputs skip the MXU selection path (no int MXU on v7x).
        return _reference(x, k)

    hc, wc = ho * k, wo * k
    if hc != h or wc != w:
        # TODO(synk): floor-mode crop copies the tensor when H or W % k != 0.
        x = x[:, :, :hc, :wc]

    itemsize = jnp.dtype(x.dtype).itemsize
    sub = _sublane_multiple(x.dtype)
    scoped_vmem, blk_target = _vmem_budget()

    # Number of k-row pooling groups in memory order; G may pack groups across
    # channel/image boundaries (each group is complete, computation is group-local).
    total_groups = n * c * ho
    groups = _choose_groups(total_groups, k, wc, wo, itemsize, blk_target)
    m = total_groups // groups
    lin = groups * k * wc
    lout = groups * wo

    # contiguous (free) reshape: each row packs `groups` complete pooling row-groups
    x2d = x.reshape(m, lin)

    # Row-tile sizing: ~blk_target bytes per input block, dtype-aware sublane multiple.
    row_bytes = lin * itemsize
    if m <= sub:
        tm = m
    else:
        tm = max(sub, (blk_target // max(row_bytes, 1)) // sub * sub)
        # keep >= 2 tiles so the "parallel" axis can shard across v7x's two TCs
        tm = min(tm, _round_up(_cdiv(m, 2), sub))
        tm = min(tm, m)
    # Ragged last tile (no jnp.pad, no output slice): OOB reads are row-local
    # garbage, OOB writes are dropped.
    num_tiles = _cdiv(m, tm)

    kernel = _make_maxpool_kernel(k, groups, wc, wo)
    cost = pl.CostEstimate(
        flops=2 * m * lin * wo,                       # the tiny selection matmuls
        transcendentals=0,
        bytes_accessed=m * (lin + lout) * itemsize,   # mem-bound: one read, one write
    )

    out2d = pl.pallas_call(
        kernel,
        out_shape=jax.ShapeDtypeStruct((m, lout), x.dtype),
        grid=(num_tiles,),
        in_specs=[pl.BlockSpec((tm, lin), lambda i: (i, 0))],
        out_specs=pl.BlockSpec((tm, lout), lambda i: (i, 0)),
        compiler_params=pltpu.CompilerParams(
            dimension_semantics=("parallel",),
            vmem_limit_bytes=int(scoped_vmem),
        ),
        cost_estimate=cost,
    )(x2d)

    # free reshape back to the NCHW pooled output
    return out2d.reshape(n, c, ho, wo)


if __name__ == "__main__":
    N, C, H, W, K = 2, 4, 16, 16, 2

    x = jax.random.normal(jax.random.PRNGKey(0), (N, C, H, W), dtype=jnp.float32)

    out = max_pool_2d(x, k=K)
    out = jax.block_until_ready(out)

    ref = _reference(x, k=K)
    assert out.shape == (N, C, H // K, W // K), out.shape
    assert jnp.allclose(out, ref, atol=1e-6, rtol=1e-6), \
        float(jnp.max(jnp.abs(out - ref)))

    print("KERNEL_OK")
</pallas_src>

<mosaic_0001>
module attributes {stable_mosaic.version = 11 : i64} {
  func.func @kernel(%arg0: i32, %arg1: memref<4x512xf32, #tpu.memory_space<vmem>>, %arg2: memref<4x128xf32, #tpu.memory_space<vmem>>) attributes {dimension_semantics = [#tpu.dimension_semantics<parallel>], iteration_bounds = array<i64: 1>, scalar_prefetch = 0 : i64, scratch_operands = 0 : i64, tpu.core_type = #tpu.core_type<tc>, window_params = [{transform_indices = @transform_0, window_bounds = array<i64: 4, 512>}, {transform_indices = @transform_1, window_bounds = array<i64: 4, 128>}]} {
    %0 = tpu.iota {dimensions = array<i32: 0>} : vector<16x8xi32>
    %1 = tpu.iota {dimensions = array<i32: 1>} : vector<16x8xi32>
    %c2_i32 = arith.constant 2 : i32
    %2 = vector.broadcast %c2_i32 : i32 to vector<16x8xi32>
    %3 = arith.muli %1, %2 : vector<16x8xi32>
    %c0_i32 = arith.constant 0 : i32
    %4 = vector.broadcast %c0_i32 : i32 to vector<16x8xi32>
    %5 = arith.addi %3, %4 : vector<16x8xi32>
    %6 = arith.cmpi eq, %0, %5 : vector<16x8xi32>
    %7 = arith.extui %6 : vector<16x8xi1> to vector<16x8xi32>
    %8 = arith.sitofp %7 : vector<16x8xi32> to vector<16x8xf32>
    %c2_i32_0 = arith.constant 2 : i32
    %9 = vector.broadcast %c2_i32_0 : i32 to vector<16x8xi32>
    %10 = arith.muli %1, %9 : vector<16x8xi32>
    %c1_i32 = arith.constant 1 : i32
    %11 = vector.broadcast %c1_i32 : i32 to vector<16x8xi32>
    %12 = arith.addi %10, %11 : vector<16x8xi32>
    %13 = arith.cmpi eq, %0, %12 : vector<16x8xi32>
    %14 = arith.extui %13 : vector<16x8xi1> to vector<16x8xi32>
    %15 = arith.sitofp %14 : vector<16x8xi32> to vector<16x8xf32>
    %c0 = arith.constant 0 : index
    %c0_1 = arith.constant 0 : index
    %16 = vector.load %arg1[%c0, %c0_1] : memref<4x512xf32, #tpu.memory_space<vmem>>, vector<4x16xf32>
    %c0_2 = arith.constant 0 : index
    %c16 = arith.constant 16 : index
    %17 = vector.load %arg1[%c0_2, %c16] : memref<4x512xf32, #tpu.memory_space<vmem>>, vector<4x16xf32>
    %18 = arith.maximumf %16, %17 : vector<4x16xf32>
    %cst = arith.constant dense<0.000000e+00> : vector<4x8xf32>
    %19 = tpu.matmul %18, %8, %cst {dimension_numbers = #tpu.dot_dimension_numbers<[1], [0], [0], [1], [0, 0, 1, 1], [], []>} : vector<4x16xf32>, vector<16x8xf32>, vector<4x8xf32> -> vector<4x8xf32>
    %cst_3 = arith.constant dense<0.000000e+00> : vector<4x8xf32>
    %20 = tpu.matmul %18, %15, %cst_3 {dimension_numbers = #tpu.dot_dimension_numbers<[1], [0], [0], [1], [0, 0, 1, 1], [], []>} : vector<4x16xf32>, vector<16x8xf32>, vector<4x8xf32> -> vector<4x8xf32>
    %21 = arith.maximumf %19, %20 : vector<4x8xf32>
    %c0_4 = arith.constant 0 : index
    %c0_5 = arith.constant 0 : index
    %22 = vector.load %arg2[%c0_4, %c0_5] : memref<4x128xf32, #tpu.memory_space<vmem>>, vector<4x8xf32>
    tpu.vector_store %arg2[%c0_4, %c0_5], %21 {strides = array<i32>} : memref<4x128xf32, #tpu.memory_space<vmem>>, vector<4x8xf32>,
    %c0_6 = arith.constant 0 : index
    %c32 = arith.constant 32 : index
    %23 = vector.load %arg1[%c0_6, %c32] : memref<4x512xf32, #tpu.memory_space<vmem>>, vector<4x16xf32>
    %c0_7 = arith.constant 0 : index
    %c48 = arith.constant 48 : index
    %24 = vector.load %arg1[%c0_7, %c48] : memref<4x512xf32, #tpu.memory_space<vmem>>, vector<4x16xf32>
    %25 = arith.maximumf %23, %24 : vector<4x16xf32>
    %cst_8 = arith.constant dense<0.000000e+00> : vector<4x8xf32>
    %26 = tpu.matmul %25, %8, %cst_8 {dimension_numbers = #tpu.dot_dimension_numbers<[1], [0], [0], [1], [0, 0, 1, 1], [], []>} : vector<4x16xf32>, vector<16x8xf32>, vector<4x8xf32> -> vector<4x8xf32>
    %cst_9 = arith.constant dense<0.000000e+00> : vector<4x8xf32>
    %27 = tpu.matmul %25, %15, %cst_9 {dimension_numbers = #tpu.dot_dimension_numbers<[1], [0], [0], [1], [0, 0, 1, 1], [], []>} : vector<4x16xf32>, vector<16x8xf32>, vector<4x8xf32> -> vector<4x8xf32>
    %28 = arith.maximumf %26, %27 : vector<4x8xf32>
    %c0_10 = arith.constant 0 : index
    %c8 = arith.constant 8 : index
    %29 = vector.load %arg2[%c0_10, %c8] : memref<4x128xf32, #tpu.memory_space<vmem>>, vector<4x8xf32>
    tpu.vector_store %arg2[%c0_10, %c8], %28 {strides = array<i32>} : memref<4x128xf32, #tpu.memory_space<vmem>>, vector<4x8xf32>,
    %c0_11 = arith.constant 0 : index
    %c64 = arith.constant 64 : index
    %30 = vector.load %arg1[%c0_11, %c64] : memref<4x512xf32, #tpu.memory_space<vmem>>, vector<4x16xf32>
    %c0_12 = arith.constant 0 : index
    %c80 = arith.constant 80 : index
    %31 = vector.load %arg1[%c0_12, %c80] : memref<4x512xf32, #tpu.memory_space<vmem>>, vector<4x16xf32>
    %32 = arith.maximumf %30, %31 : vector<4x16xf32>
    %cst_13 = arith.constant dense<0.000000e+00> : vector<4x8xf32>
    %33 = tpu.matmul %32, %8, %cst_13 {dimension_numbers = #tpu.dot_dimension_numbers<[1], [0], [0], [1], [0, 0, 1, 1], [], []>} : vector<4x16xf32>, vector<16x8xf32>, vector<4x8xf32> -> vector<4x8xf32>
    %cst_14 = arith.constant dense<0.000000e+00> : vector<4x8xf32>
    %34 = tpu.matmul %32, %15, %cst_14 {dimension_numbers = #tpu.dot_dimension_numbers<[1], [0], [0], [1], [0, 0, 1, 1], [], []>} : vector<4x16xf32>, vector<16x8xf32>, vector<4x8xf32> -> vector<4x8xf32>
    %35 = arith.maximumf %33, %34 : vector<4x8xf32>
    %c0_15 = arith.constant 0 : index
    %c16_16 = arith.constant 16 : index
    %36 = vector.load %arg2[%c0_15, %c16_16] : memref<4x128xf32, #tpu.memory_space<vmem>>, vector<4x8xf32>
    tpu.vector_store %arg2[%c0_15, %c16_16], %35 {strides = array<i32>} : memref<4x128xf32, #tpu.memory_space<vmem>>, vector<4x8xf32>,
    %c0_17 = arith.constant 0 : index
    %c96 = arith.constant 96 : index
    %37 = vector.load %arg1[%c0_17, %c96] : memref<4x512xf32, #tpu.memory_space<vmem>>, vector<4x16xf32>
    %c0_18 = arith.constant 0 : index
    %c112 = arith.constant 112 : index
    %38 = vector.load %arg1[%c0_18, %c112] : memref<4x512xf32, #tpu.memory_space<vmem>>, vector<4x16xf32>
    %39 = arith.maximumf %37, %38 : vector<4x16xf32>
    %cst_19 = arith.constant dense<0.000000e+00> : vector<4x8xf32>
    %40 = tpu.matmul %39, %8, %cst_19 {dimension_numbers = #tpu.dot_dimension_numbers<[1], [0], [0], [1], [0, 0, 1, 1], [], []>} : vector<4x16xf32>, vector<16x8xf32>, vector<4x8xf32> -> vector<4x8xf32>
    %cst_20 = arith.constant dense<0.000000e+00> : vector<4x8xf32>
    %41 = tpu.matmul %39, %15, %cst_20 {dimension_numbers = #tpu.dot_dimension_numbers<[1], [0], [0], [1], [0, 0, 1, 1], [], []>} : vector<4x16xf32>, vector<16x8xf32>, vector<4x8xf32> -> vector<4x8xf32>
    %42 = arith.maximumf %40, %41 : vector<4x8xf32>
    %c0_21 = arith.constant 0 : index
    %c24 = arith.constant 24 : index
    %43 = vector.load %arg2[%c0_21, %c24] : memref<4x128xf32, #tpu.memory_space<vmem>>, vector<4x8xf32>
    tpu.vector_store %arg2[%c0_21, %c24], %42 {strides = array<i32>} : memref<4x128xf32, #tpu.memory_space<vmem>>, vector<4x8xf32>,
    %c0_22 = arith.constant 0 : index
    %c128 = arith.constant 128 : index
    %44 = vector.load %arg1[%c0_22, %c128] : memref<4x512xf32, #tpu.memory_space<vmem>>, vector<4x16xf32>
    %c0_23 = arith.constant 0 : index
    %c144 = arith.constant 144 : index
    %45 = vector.load %arg1[%c0_23, %c144] : memref<4x512xf32, #tpu.memory_space<vmem>>, vector<4x16xf32>
    %46 = arith.maximumf %44, %45 : vector<4x16xf32>
    %cst_24 = arith.constant dense<0.000000e+00> : vector<4x8xf32>
    %47 = tpu.matmul %46, %8, %cst_24 {dimension_numbers = #tpu.dot_dimension_numbers<[1], [0], [0], [1], [0, 0, 1, 1], [], []>} : vector<4x16xf32>, vector<16x8xf32>, vector<4x8xf32> -> vector<4x8xf32>
    %cst_25 = arith.constant dense<0.000000e+00> : vector<4x8xf32>
    %48 = tpu.matmul %46, %15, %cst_25 {dimension_numbers = #tpu.dot_dimension_numbers<[1], [0], [0], [1], [0, 0, 1, 1], [], []>} : vector<4x16xf32>, vector<16x8xf32>, vector<4x8xf32> -> vector<4x8xf32>
    %49 = arith.maximumf %47, %48 : vector<4x8xf32>
    %c0_26 = arith.constant 0 : index
    %c32_27 = arith.constant 32 : index
    %50 = vector.load %arg2[%c0_26, %c32_27] : memref<4x128xf32, #tpu.memory_space<vmem>>, vector<4x8xf32>
    tpu.vector_store %arg2[%c0_26, %c32_27], %49 {strides = array<i32>} : memref<4x128xf32, #tpu.memory_space<vmem>>, vector<4x8xf32>,
    %c0_28 = arith.constant 0 : index
    %c160 = arith.constant 160 : index
    %51 = vector.load %arg1[%c0_28, %c160] : memref<4x512xf32, #tpu.memory_space<vmem>>, vector<4x16xf32>
    %c0_29 = arith.constant 0 : index
    %c176 = arith.constant 176 : index
    %52 = vector.load %arg1[%c0_29, %c176] : memref<4x512xf32, #tpu.memory_space<vmem>>, vector<4x16xf32>
    %53 = arith.maximumf %51, %52 : vector<4x16xf32>
    %cst_30 = arith.constant dense<0.000000e+00> : vector<4x8xf32>
    %54 = tpu.matmul %53, %8, %cst_30 {dimension_numbers = #tpu.dot_dimension_numbers<[1], [0], [0], [1], [0, 0, 1, 1], [], []>} : vector<4x16xf32>, vector<16x8xf32>, vector<4x8xf32> -> vector<4x8xf32>
    %cst_31 = arith.constant dense<0.000000e+00> : vector<4x8xf32>
    %55 = tpu.matmul %53, %15, %cst_31 {dimension_numbers = #tpu.dot_dimension_numbers<[1], [0], [0], [1], [0, 0, 1, 1], [], []>} : vector<4x16xf32>, vector<16x8xf32>, vector<4x8xf32> -> vector<4x8xf32>
    %56 = arith.maximumf %54, %55 : vector<4x8xf32>
    %c0_32 = arith.constant 0 : index
    %c40 = arith.constant 40 : index
    %57 = vector.load %arg2[%c0_32, %c40] : memref<4x128xf32, #tpu.memory_space<vmem>>, vector<4x8xf32>
    tpu.vector_store %arg2[%c0_32, %c40], %56 {strides = array<i32>} : memref<4x128xf32, #tpu.memory_space<vmem>>, vector<4x8xf32>,
    %c0_33 = arith.constant 0 : index
    %c192 = arith.constant 192 : index
    %58 = vector.load %arg1[%c0_33, %c192] : memref<4x512xf32, #tpu.memory_space<vmem>>, vector<4x16xf32>
    %c0_34 = arith.constant 0 : index
    %c208 = arith.constant 208 : index
    %59 = vector.load %arg1[%c0_34, %c208] : memref<4x512xf32, #tpu.memory_space<vmem>>, vector<4x16xf32>
    %60 = arith.maximumf %58, %59 : vector<4x16xf32>
    %cst_35 = arith.constant dense<0.000000e+00> : vector<4x8xf32>
    %61 = tpu.matmul %60, %8, %cst_35 {dimension_numbers = #tpu.dot_dimension_numbers<[1], [0], [0], [1], [0, 0, 1, 1], [], []>} : vector<4x16xf32>, vector<16x8xf32>, vector<4x8xf32> -> vector<4x8xf32>
    %cst_36 = arith.constant dense<0.000000e+00> : vector<4x8xf32>
    %62 = tpu.matmul %60, %15, %cst_36 {dimension_numbers = #tpu.dot_dimension_numbers<[1], [0], [0], [1], [0, 0, 1, 1], [], []>} : vector<4x16xf32>, vector<16x8xf32>, vector<4x8xf32> -> vector<4x8xf32>
    %63 = arith.maximumf %61, %62 : vector<4x8xf32>
    %c0_37 = arith.constant 0 : index
    %c48_38 = arith.constant 48 : index
    %64 = vector.load %arg2[%c0_37, %c48_38] : memref<4x128xf32, #tpu.memory_space<vmem>>, vector<4x8xf32>
    tpu.vector_store %arg2[%c0_37, %c48_38], %63 {strides = array<i32>} : memref<4x128xf32, #tpu.memory_space<vmem>>, vector<4x8xf32>,
    %c0_39 = arith.constant 0 : index
    %c224 = arith.constant 224 : index
    %65 = vector.load %arg1[%c0_39, %c224] : memref<4x512xf32, #tpu.memory_space<vmem>>, vector<4x16xf32>
    %c0_40 = arith.constant 0 : index
    %c240 = arith.constant 240 : index
    %66 = vector.load %arg1[%c0_40, %c240] : memref<4x512xf32, #tpu.memory_space<vmem>>, vector<4x16xf32>
    %67 = arith.maximumf %65, %66 : vector<4x16xf32>
    %cst_41 = arith.constant dense<0.000000e+00> : vector<4x8xf32>
    %68 = tpu.matmul %67, %8, %cst_41 {dimension_numbers = #tpu.dot_dimension_numbers<[1], [0], [0], [1], [0, 0, 1, 1], [], []>} : vector<4x16xf32>, vector<16x8xf32>, vector<4x8xf32> -> vector<4x8xf32>
    %cst_42 = arith.constant dense<0.000000e+00> : vector<4x8xf32>
    %69 = tpu.matmul %67, %15, %cst_42 {dimension_numbers = #tpu.dot_dimension_numbers<[1], [0], [0], [1], [0, 0, 1, 1], [], []>} : vector<4x16xf32>, vector<16x8xf32>, vector<4x8xf32> -> vector<4x8xf32>
    %70 = arith.maximumf %68, %69 : vector<4x8xf32>
    %c0_43 = arith.constant 0 : index
    %c56 = arith.constant 56 : index
    %71 = vector.load %arg2[%c0_43, %c56] : memref<4x128xf32, #tpu.memory_space<vmem>>, vector<4x8xf32>
    tpu.vector_store %arg2[%c0_43, %c56], %70 {strides = array<i32>} : memref<4x128xf32, #tpu.memory_space<vmem>>, vector<4x8xf32>,
    %c0_44 = arith.constant 0 : index
    %c256 = arith.constant 256 : index
    %72 = vector.load %arg1[%c0_44, %c256] : memref<4x512xf32, #tpu.memory_space<vmem>>, vector<4x16xf32>
    %c0_45 = arith.constant 0 : index
    %c272 = arith.constant 272 : index
    %73 = vector.load %arg1[%c0_45, %c272] : memref<4x512xf32, #tpu.memory_space<vmem>>, vector<4x16xf32>
    %74 = arith.maximumf %72, %73 : vector<4x16xf32>
    %cst_46 = arith.constant dense<0.000000e+00> : vector<4x8xf32>
    %75 = tpu.matmul %74, %8, %cst_46 {dimension_numbers = #tpu.dot_dimension_numbers<[1], [0], [0], [1], [0, 0, 1, 1], [], []>} : vector<4x16xf32>, vector<16x8xf32>, vector<4x8xf32> -> vector<4x8xf32>
    %cst_47 = arith.constant dense<0.000000e+00> : vector<4x8xf32>
    %76 = tpu.matmul %74, %15, %cst_47 {dimension_numbers = #tpu.dot_dimension_numbers<[1], [0], [0], [1], [0, 0, 1, 1], [], []>} : vector<4x16xf32>, vector<16x8xf32>, vector<4x8xf32> -> vector<4x8xf32>
    %77 = arith.maximumf %75, %76 : vector<4x8xf32>
    %c0_48 = arith.constant 0 : index
    %c64_49 = arith.constant 64 : index
    %78 = vector.load %arg2[%c0_48, %c64_49] : memref<4x128xf32, #tpu.memory_space<vmem>>, vector<4x8xf32>
    tpu.vector_store %arg2[%c0_48, %c64_49], %77 {strides = array<i32>} : memref<4x128xf32, #tpu.memory_space<vmem>>, vector<4x8xf32>,
    %c0_50 = arith.constant 0 : index
    %c288 = arith.constant 288 : index
    %79 = vector.load %arg1[%c0_50, %c288] : memref<4x512xf32, #tpu.memory_space<vmem>>, vector<4x16xf32>
    %c0_51 = arith.constant 0 : index
    %c304 = arith.constant 304 : index
    %80 = vector.load %arg1[%c0_51, %c304] : memref<4x512xf32, #tpu.memory_space<vmem>>, vector<4x16xf32>
    %81 = arith.maximumf %79, %80 : vector<4x16xf32>
    %cst_52 = arith.constant dense<0.000000e+00> : vector<4x8xf32>
    %82 = tpu.matmul %81, %8, %cst_52 {dimension_numbers = #tpu.dot_dimension_numbers<[1], [0], [0], [1], [0, 0, 1, 1], [], []>} : vector<4x16xf32>, vector<16x8xf32>, vector<4x8xf32> -> vector<4x8xf32>
    %cst_53 = arith.constant dense<0.000000e+00> : vector<4x8xf32>
    %83 = tpu.matmul %81, %15, %cst_53 {dimension_numbers = #tpu.dot_dimension_numbers<[1], [0], [0], [1], [0, 0, 1, 1], [], []>} : vector<4x16xf32>, vector<16x8xf32>, vector<4x8xf32> -> vector<4x8xf32>
    %84 = arith.maximumf %82, %83 : vector<4x8xf32>
    %c0_54 = arith.constant 0 : index
    %c72 = arith.constant 72 : index
    %85 = vector.load %arg2[%c0_54, %c72] : memref<4x128xf32, #tpu.memory_space<vmem>>, vector<4x8xf32>
    tpu.vector_store %arg2[%c0_54, %c72], %84 {strides = array<i32>} : memref<4x128xf32, #tpu.memory_space<vmem>>, vector<4x8xf32>,
    %c0_55 = arith.constant 0 : index
    %c320 = arith.constant 320 : index
    %86 = vector.load %arg1[%c0_55, %c320] : memref<4x512xf32, #tpu.memory_space<vmem>>, vector<4x16xf32>
    %c0_56 = arith.constant 0 : index
    %c336 = arith.constant 336 : index
    %87 = vector.load %arg1[%c0_56, %c336] : memref<4x512xf32, #tpu.memory_space<vmem>>, vector<4x16xf32>
    %88 = arith.maximumf %86, %87 : vector<4x16xf32>
    %cst_57 = arith.constant dense<0.000000e+00> : vector<4x8xf32>
    %89 = tpu.matmul %88, %8, %cst_57 {dimension_numbers = #tpu.dot_dimension_numbers<[1], [0], [0], [1], [0, 0, 1, 1], [], []>} : vector<4x16xf32>, vector<16x8xf32>, vector<4x8xf32> -> vector<4x8xf32>
    %cst_58 = arith.constant dense<0.000000e+00> : vector<4x8xf32>
    %90 = tpu.matmul %88, %15, %cst_58 {dimension_numbers = #tpu.dot_dimension_numbers<[1], [0], [0], [1], [0, 0, 1, 1], [], []>} : vector<4x16xf32>, vector<16x8xf32>, vector<4x8xf32> -> vector<4x8xf32>
    %91 = arith.maximumf %89, %90 : vector<4x8xf32>
    %c0_59 = arith.constant 0 : index
    %c80_60 = arith.constant 80 : index
    %92 = vector.load %arg2[%c0_59, %c80_60] : memref<4x128xf32, #tpu.memory_space<vmem>>, vector<4x8xf32>
    tpu.vector_store %arg2[%c0_59, %c80_60], %91 {strides = array<i32>} : memref<4x128xf32, #tpu.memory_space<vmem>>, vector<4x8xf32>,
    %c0_61 = arith.constant 0 : index
    %c352 = arith.constant 352 : index
    %93 = vector.load %arg1[%c0_61, %c352] : memref<4x512xf32, #tpu.memory_space<vmem>>, vector<4x16xf32>
    %c0_62 = arith.constant 0 : index
    %c368 = arith.constant 368 : index
    %94 = vector.load %arg1[%c0_62, %c368] : memref<4x512xf32, #tpu.memory_space<vmem>>, vector<4x16xf32>
    %95 = arith.maximumf %93, %94 : vector<4x16xf32>
    %cst_63 = arith.constant dense<0.000000e+00> : vector<4x8xf32>
    %96 = tpu.matmul %95, %8, %cst_63 {dimension_numbers = #tpu.dot_dimension_numbers<[1], [0], [0], [1], [0, 0, 1, 1], [], []>} : vector<4x16xf32>, vector<16x8xf32>, vector<4x8xf32> -> vector<4x8xf32>
    %cst_64 = arith.constant dense<0.000000e+00> : vector<4x8xf32>
    %97 = tpu.matmul %95, %15, %cst_64 {dimension_numbers = #tpu.dot_dimension_numbers<[1], [0], [0], [1], [0, 0, 1, 1], [], []>} : vector<4x16xf32>, vector<16x8xf32>, vector<4x8xf32> -> vector<4x8xf32>
    %98 = arith.maximumf %96, %97 : vector<4x8xf32>
    %c0_65 = arith.constant 0 : index
    %c88 = arith.constant 88 : index
    %99 = vector.load %arg2[%c0_65, %c88] : memref<4x128xf32, #tpu.memory_space<vmem>>, vector<4x8xf32>
    tpu.vector_store %arg2[%c0_65, %c88], %98 {strides = array<i32>} : memref<4x128xf32, #tpu.memory_space<vmem>>, vector<4x8xf32>,
    %c0_66 = arith.constant 0 : index
    %c384 = arith.constant 384 : index
    %100 = vector.load %arg1[%c0_66, %c384] : memref<4x512xf32, #tpu.memory_space<vmem>>, vector<4x16xf32>
    %c0_67 = arith.constant 0 : index
    %c400 = arith.constant 400 : index
    %101 = vector.load %arg1[%c0_67, %c400] : memref<4x512xf32, #tpu.memory_space<vmem>>, vector<4x16xf32>
    %102 = arith.maximumf %100, %101 : vector<4x16xf32>
    %cst_68 = arith.constant dense<0.000000e+00> : vector<4x8xf32>
    %103 = tpu.matmul %102, %8, %cst_68 {dimension_numbers = #tpu.dot_dimension_numbers<[1], [0], [0], [1], [0, 0, 1, 1], [], []>} : vector<4x16xf32>, vector<16x8xf32>, vector<4x8xf32> -> vector<4x8xf32>
    %cst_69 = arith.constant dense<0.000000e+00> : vector<4x8xf32>
    %104 = tpu.matmul %102, %15, %cst_69 {dimension_numbers = #tpu.dot_dimension_numbers<[1], [0], [0], [1], [0, 0, 1, 1], [], []>} : vector<4x16xf32>, vector<16x8xf32>, vector<4x8xf32> -> vector<4x8xf32>
    %105 = arith.maximumf %103, %104 : vector<4x8xf32>
    %c0_70 = arith.constant 0 : index
    %c96_71 = arith.constant 96 : index
    %106 = vector.load %arg2[%c0_70, %c96_71] : memref<4x128xf32, #tpu.memory_space<vmem>>, vector<4x8xf32>
    tpu.vector_store %arg2[%c0_70, %c96_71], %105 {strides = array<i32>} : memref<4x128xf32, #tpu.memory_space<vmem>>, vector<4x8xf32>,
    %c0_72 = arith.constant 0 : index
    %c416 = arith.constant 416 : index
    %107 = vector.load %arg1[%c0_72, %c416] : memref<4x512xf32, #tpu.memory_space<vmem>>, vector<4x16xf32>
    %c0_73 = arith.constant 0 : index
    %c432 = arith.constant 432 : index
    %108 = vector.load %arg1[%c0_73, %c432] : memref<4x512xf32, #tpu.memory_space<vmem>>, vector<4x16xf32>
    %109 = arith.maximumf %107, %108 : vector<4x16xf32>
    %cst_74 = arith.constant dense<0.000000e+00> : vector<4x8xf32>
    %110 = tpu.matmul %109, %8, %cst_74 {dimension_numbers = #tpu.dot_dimension_numbers<[1], [0], [0], [1], [0, 0, 1, 1], [], []>} : vector<4x16xf32>, vector<16x8xf32>, vector<4x8xf32> -> vector<4x8xf32>
    %cst_75 = arith.constant dense<0.000000e+00> : vector<4x8xf32>
    %111 = tpu.matmul %109, %15, %cst_75 {dimension_numbers = #tpu.dot_dimension_numbers<[1], [0], [0], [1], [0, 0, 1, 1], [], []>} : vector<4x16xf32>, vector<16x8xf32>, vector<4x8xf32> -> vector<4x8xf32>
    %112 = arith.maximumf %110, %111 : vector<4x8xf32>
    %c0_76 = arith.constant 0 : index
    %c104 = arith.constant 104 : index
    %113 = vector.load %arg2[%c0_76, %c104] : memref<4x128xf32, #tpu.memory_space<vmem>>, vector<4x8xf32>
    tpu.vector_store %arg2[%c0_76, %c104], %112 {strides = array<i32>} : memref<4x128xf32, #tpu.memory_space<vmem>>, vector<4x8xf32>,
    %c0_77 = arith.constant 0 : index
    %c448 = arith.constant 448 : index
    %114 = vector.load %arg1[%c0_77, %c448] : memref<4x512xf32, #tpu.memory_space<vmem>>, vector<4x16xf32>
    %c0_78 = arith.constant 0 : index
    %c464 = arith.constant 464 : index
    %115 = vector.load %arg1[%c0_78, %c464] : memref<4x512xf32, #tpu.memory_space<vmem>>, vector<4x16xf32>
    %116 = arith.maximumf %114, %115 : vector<4x16xf32>
    %cst_79 = arith.constant dense<0.000000e+00> : vector<4x8xf32>
    %117 = tpu.matmul %116, %8, %cst_79 {dimension_numbers = #tpu.dot_dimension_numbers<[1], [0], [0], [1], [0, 0, 1, 1], [], []>} : vector<4x16xf32>, vector<16x8xf32>, vector<4x8xf32> -> vector<4x8xf32>
    %cst_80 = arith.constant dense<0.000000e+00> : vector<4x8xf32>
    %118 = tpu.matmul %116, %15, %cst_80 {dimension_numbers = #tpu.dot_dimension_numbers<[1], [0], [0], [1], [0, 0, 1, 1], [], []>} : vector<4x16xf32>, vector<16x8xf32>, vector<4x8xf32> -> vector<4x8xf32>
    %119 = arith.maximumf %117, %118 : vector<4x8xf32>
    %c0_81 = arith.constant 0 : index
    %c112_82 = arith.constant 112 : index
    %120 = vector.load %arg2[%c0_81, %c112_82] : memref<4x128xf32, #tpu.memory_space<vmem>>, vector<4x8xf32>
    tpu.vector_store %arg2[%c0_81, %c112_82], %119 {strides = array<i32>} : memref<4x128xf32, #tpu.memory_space<vmem>>, vector<4x8xf32>,
    %c0_83 = arith.constant 0 : index
    %c480 = arith.constant 480 : index
    %121 = vector.load %arg1[%c0_83, %c480] : memref<4x512xf32, #tpu.memory_space<vmem>>, vector<4x16xf32>
    %c0_84 = arith.constant 0 : index
    %c496 = arith.constant 496 : index
    %122 = vector.load %arg1[%c0_84, %c496] : memref<4x512xf32, #tpu.memory_space<vmem>>, vector<4x16xf32>
    %123 = arith.maximumf %121, %122 : vector<4x16xf32>
    %cst_85 = arith.constant dense<0.000000e+00> : vector<4x8xf32>
    %124 = tpu.matmul %123, %8, %cst_85 {dimension_numbers = #tpu.dot_dimension_numbers<[1], [0], [0], [1], [0, 0, 1, 1], [], []>} : vector<4x16xf32>, vector<16x8xf32>, vector<4x8xf32> -> vector<4x8xf32>
    %cst_86 = arith.constant dense<0.000000e+00> : vector<4x8xf32>
    %125 = tpu.matmul %123, %15, %cst_86 {dimension_numbers = #tpu.dot_dimension_numbers<[1], [0], [0], [1], [0, 0, 1, 1], [], []>} : vector<4x16xf32>, vector<16x8xf32>, vector<4x8xf32> -> vector<4x8xf32>
    %126 = arith.maximumf %124, %125 : vector<4x8xf32>
    %c0_87 = arith.constant 0 : index
    %c120 = arith.constant 120 : index
    %127 = vector.load %arg2[%c0_87, %c120] : memref<4x128xf32, #tpu.memory_space<vmem>>, vector<4x8xf32>
    tpu.vector_store %arg2[%c0_87, %c120], %126 {strides = array<i32>} : memref<4x128xf32, #tpu.memory_space<vmem>>, vector<4x8xf32>,
    return
  }
  func.func @transform_0(%arg0: i32) -> (i32, i32) {
    %c0_i32 = arith.constant 0 : i32
    %c0_i32_0 = arith.constant 0 : i32
    return %arg0, %c0_i32 : i32, i32
  }
  func.func @transform_1(%arg0: i32) -> (i32, i32) {
    %c0_i32 = arith.constant 0 : i32
    %c0_i32_0 = arith.constant 0 : i32
    return %arg0, %c0_i32 : i32, i32
  }
}

</mosaic_0001>

<bundles_post_ra>
// kernel: tpu_custom_call.1
= control target key start
LH: loop header
LB: loop body
LE: loop exit
PB: predicated region body
PF: predicated region fallthrough
CT: control target
= control target key end

     0   :  { %6 = vsyncpa [#allocation3], 0  ;;  %s3528_s0 = inlined_call_operand.hbm [shape: f32[4,512], index: 0, kind: input, shape index: {}]   ;;  %s3529_s1 = inlined_call_operand.hbm [shape: f32[4,128], index: 1, kind: output, shape index: {}]  }
   0x1   :  { %7 = vsyncpa [#allocation4], 0  ;;  %s3157_s6 = smov [#allocation2]   ;;  %s3109_s10 = scalar_lea.hbm %s3528_s0, 256 }
   0x2   :  { %s14_s7 = sshll.u32 %s3157_s6, 4  ;;  %p3110_p0 = scmp.ne.s32.totalorder %s3528_s0, %s3109_s10  ;;  %s15_s7 = int_to_ptr.vmem [resolvable:$true] %s14_s7 }
   0x3   :  { %p3113_p1 = scmp.lt.u32.totalorder %s3109_s10, %s3528_s0 }
   0x5   :  { %p3115_p2 = pnand %p3113_p1, %p3110_p0 }
   0x7   :  { %3118 = shalt.err (!%p3115_p2)
}
   0x8   :  { %s3119_s15 = scalar_lea.vmem %s15_s7, 256  ;;  %p3124_p4 = scmp.lt.s32.totalorder %s15_s7, %s15_s7 }
   0x9   :  { %p3120_p3 = scmp.ne.s32.totalorder %s15_s7, %s3119_s15  ;;  %p3125_p5 = scmp.lt.s32.totalorder %s3119_s15, %s3119_s15 }
   0xb   :  { %p3126_p6 = por %p3125_p5, %p3124_p4 }
   0xd   :  { %p3127_p7 = pnand %p3126_p6, %p3120_p3 }
   0xf   :  { %3130 = shalt.err (!%p3127_p7)
}
  0x10   :  { %17 = dma.hbm_to_vmem [thread:$0]  %s3528_s0, 256, %s15_s7, [#allocation3]  }
  0x11   :  { %3153 = dma.done.wait [#allocation3], 256  }
  0x12   :  { %3154 = vsyncadd [#allocation3], 4294967040  ;;  %v193_v0 = vld [vmem:[#allocation2] sm:$0xf]  ;;  %s3158_s18 = smov 112   ;;  %v21_v12 = vlaneseq  ;;  %v3159_v13 = vmov 0.0|0.0  }
  0x13   :  { %v509_v1 = vld [vmem:[#allocation2] sm:$0xf]  ;;  %195 = vrot.lane.b32.xlu0 %v193_v0, %s3158_s18  ;;  %v3202_v3 = vld [vmem:[#allocation2 + $0x4] sm:$0xf]  ;;  %v3215_v6 = vld [vmem:[#allocation2 + $0x8] sm:$0xf]  ;;  %2992 = vmatprep.subr.bf16.mxu0 %v3159_v13 }
  0x14   :  { %511 = vrot.lane.b32.xlu1 %v509_v1, %s3158_s18  ;;  %v351_v2 = vld [vmem:[#allocation2] sm:$0xf]  ;;  %v3207_v4 = vld [vmem:[#allocation2 + $0x4] sm:$0xf]  ;;  %v3217_v7 = vld [vmem:[#allocation2 + $0x8] sm:$0xf]  ;;  %2995 = vmatprep.subr.bf16.mxu1 %v3159_v13 }
  0x15   :  { %v3209_v5 = vld [vmem:[#allocation2 + $0x4] sm:$0xf]  ;;  %v3223_v8 = vld [vmem:[#allocation2 + $0x8] sm:$0xf]  ;;  %v3225_v9 = vld [vmem:[#allocation2 + $0xc] sm:$0xf] }
  0x16   :  { %v3231_v10 = vld [vmem:[#allocation2 + $0xc] sm:$0xf]  ;;  %v3233_v11 = vld [vmem:[#allocation2] sm:$0xf]  ;;  %v22_v14 = vshrl.u32 %v21_v12, 7  ;;  %v25_v15 = vand.u32 127, %v21_v12 }
  0x17   :  { %353 = vrot.lane.b32.xlu0 %v351_v2, %s3158_s18  ;;  %vm3160_vm0 = vmmov 0   ;;  %v3161_v16 = vmov 0.0   ;;  %v3245_v17 = vld [vmem:[#allocation2 + $0xc] sm:$0xf]  ;;  %v3162_v22 = vmov 1.0|1.0  }
  0x18   :  { %825 = vrot.lane.b32.xlu1 %v3202_v3, %s3158_s18  ;;  %2772 = vmatprep.mubr.msk.f32.mxu0 %vm3160_vm0, %v3161_v16  ;;  %v23_v18 = vadd.s32 8, %v22_v14  ;;  %v26_v19 = vmul.u32 2, %v25_v15  ;;  %s3163_s0 = smov 96   ;;  %s3164_s19 = smov 64   ;;  %v3269_v32 = vld [vmem:[#allocation2 + $0x4] sm:$0xf] }
  0x19   :  { %2779 = vmatprep.mubr.msk.f32.mxu1 %vm3160_vm0, %v3161_v16  ;;  %s3165_s20 = smov 32   ;;  %v3279_v40 = vld [vmem:[#allocation2 + $0x8] sm:$0xf]  ;;  %vm46_vm7 = vcmask 130048   ;;  %v3290_v49 = vld [vmem:[#allocation2 + $0xc] sm:$0xf] }
  0x1a   :  { %vm27_vm1 = vcmp.eq.s32.totalorder %v22_v14, %v26_v19  ;;  %vm28_vm2 = vcmp.eq.s32.totalorder %v23_v18, %v26_v19  ;;  %v33_v20 = vadd.s32 1, %v26_v19  ;;  %vm191_vm8 = vcmask 60416   ;;  %s3166_s21 = smov 8   ;;  %s3167_s22 = smov 16  }
  0x1b   :  { %983 = vrot.lane.b32.xlu0 %v3207_v4, %s3158_s18  ;;  %vm3249_vm3 = vmpackc.low %vm28_vm2, %vm27_vm1  ;;  %s3168_s23 = smov 24   ;;  %s3169_s24 = smov 40   ;;  %vm349_vm9 = vcmask 126016   ;;  %vm507_vm10 = vcmask 191616   ;;  %vm665_vm11 = vcmask 257216   ;;  %vm821_vm12 = vcmask 322816  }
  0x1c   :  { %1141 = vrot.lane.b32.xlu1 %v3209_v5, %s3158_s18  ;;  %2994 = vmatpush3.bf16.msk.msra.mxu0 %vm3249_vm3, %v3162_v22  ;;  %vm34_vm4 = vcmp.eq.s32.totalorder %v22_v14, %v33_v20  ;;  %vm35_vm5 = vcmp.eq.s32.totalorder %v23_v18, %v33_v20  ;;  %s3170_s25 = smov 48   ;;  %s3171_s26 = smov 56   ;;  %vm979_vm13 = vcmask 388416   ;;  %vm1137_vm14 = vcmask 454016  }
  0x1d   :  { %vm3256_vm6 = vmpackc.low %vm35_vm5, %vm34_vm4  ;;  %2998 = vmatprep.subr.bf16.mxu0 %v3159_v13  ;;  %s3172_s27 = smov 72   ;;  %s3173_s28 = smov 80   ;;  %vm1295_vm15 = vcmask 519616   ;;  %vm1609_vm1 = vcmask 650816   ;;  %vm1767_vm2 = vcmask 716416   ;;  %vm2081_vm4 = vcmask 847616  }
  0x1e   :  { %2997 = vmatpush3.bf16.msk.msra.mxu1 %vm3256_vm6, %v3162_v22  ;;  %s3174_s29 = smov 88   ;;  %s3175_s30 = smov 104   ;;  %vm2239_vm5 = vcmask 913216  }
  0x1f   :  { %1455 = vrot.lane.b32.xlu0 %v3215_v6, %s3158_s18  ;;  %3001 = vmatprep.subr.bf16.mxu1 %v3159_v13  ;;  %s3176_s2 = smov 120   ;;  %s3177_s3 = smov [#allocation5]  }
  0x20   :  { %1613 = vrot.lane.b32.xlu1 %v3217_v7, %s3158_s18  ;;  %s2563_s4 = sshll.u32 %s3177_s3, 4  ;;  %s2564_s4 = int_to_ptr.vmem [resolvable:$true] %s2563_s4 }
  0x21   :  { %s3131_s5 = scalar_lea.vmem %s2564_s4, 64  ;;  %p3136_p9 = scmp.lt.s32.totalorder %s2564_s4, %s2564_s4 }
  0x22   :  { %p3132_p8 = scmp.ne.s32.totalorder %s2564_s4, %s3131_s5  ;;  %p3137_p10 = scmp.lt.s32.totalorder %s3131_s5, %s3131_s5 }
  0x23   :  { %1771 = vrot.lane.b32.xlu0 %v3223_v8, %s3158_s18 }
  0x24   :  { %2085 = vrot.lane.b32.xlu1 %v3225_v9, %s3158_s18  ;;  %p3138_p11 = por %p3137_p10, %p3136_p9 }
  0x26   :  { %p3139_p12 = pnand %p3138_p11, %p3132_p8 }
  0x27   :  { %2243 = vrot.lane.b32.xlu0 %v3231_v10, %s3158_s18 }
  0x28   :  { %42 = vrot.lane.b32.xlu1 %v3233_v11, %s3158_s18 }
  0x2b   :  { %2401 = vrot.lane.b32.xlu0 %v3245_v17, %s3158_s18 }
  0x85   :  { %v196_v24 = vpop.permute.xlu0 %195 }
  0x86   :  { %v512_v25 = vpop.permute.xlu1 %511  ;;  %v198_v26 = vmax.f32 %v193_v0, %v196_v24 }
  0x87   :  { %v514_v27 = vmax.f32 %v509_v1, %v512_v25 }
  0x88   :  { %200 = vrot.lane.b32.xlu1 %v198_v26, %s3163_s0 }
  0x89   :  { %v354_v28 = vpop.permute.xlu0 %353 }
  0x8a   :  { %v826_v29 = vpop.permute.xlu1 %825  ;;  %v356_v30 = vmax.f32 %v351_v2, %v354_v28 }
  0x8b   :  { %v828_v31 = vmax.f32 %v3202_v3, %v826_v29 }
  0x8c   :  { %358 = vrot.lane.b32.xlu0 %v356_v30, %s3164_s19  ;;  %516 = vrot.lane.b32.xlu1 %v514_v27, %s3165_s20 }
  0x8d   :  { %v984_v33 = vpop.permute.xlu0 %983 }
  0x8e   :  { %v1142_v34 = vpop.permute.xlu1 %1141  ;;  %v986_v35 = vmax.f32 %v3207_v4, %v984_v33 }
  0x8f   :  { %v1144_v36 = vmax.f32 %v3209_v5, %v1142_v34 }
  0x90   :  { %669 = vrot.lane.b32.xlu0 %v3269_v32, %s3158_s18  ;;  %830 = vrot.lane.b32.xlu1 %v828_v31, %s3163_s0 }
  0x91   :  { %v1456_v37 = vpop.permute.xlu0 %1455 }
  0x92   :  { %v1614_v38 = vpop.permute.xlu1 %1613  ;;  %v1458_v39 = vmax.f32 %v3215_v6, %v1456_v37 }
  0x93   :  { %v1616_v43 = vmax.f32 %v3217_v7, %v1614_v38 }
  0x94   :  { %988 = vrot.lane.b32.xlu0 %v986_v35, %s3164_s19  ;;  %1146 = vrot.lane.b32.xlu1 %v1144_v36, %s3165_s20 }
  0x95   :  { %v1772_v41 = vpop.permute.xlu0 %1771 }
  0x96   :  { %v2086_v42 = vpop.permute.xlu1 %2085  ;;  %v1774_v44 = vmax.f32 %v3223_v8, %v1772_v41 }
  0x97   :  { %v2088_v48 = vmax.f32 %v3225_v9, %v2086_v42 }
  0x98   :  { %1299 = vrot.lane.b32.xlu0 %v3279_v40, %s3158_s18  ;;  %1460 = vrot.lane.b32.xlu1 %v1458_v39, %s3163_s0 }
  0x99   :  { %v2244_v45 = vpop.permute.xlu0 %2243 }
  0x9a   :  { %v43_v46 = vpop.permute.xlu1 %42  ;;  %v2246_v51 = vmax.f32 %v3231_v10, %v2244_v45 }
  0x9b   :  { %v45_v47 = vmax.f32 %v3233_v11, %v43_v46 }
  0x9c   :  { %1618 = vrot.lane.b32.xlu0 %v1616_v43, %s3164_s19  ;;  %1776 = vrot.lane.b32.xlu1 %v1774_v44, %s3165_s20 }
  0x9d   :  { %v2402_v50 = vpop.permute.xlu0 %2401  ;;  %2773 = vmatmul.mubr.msk.f32.vlgmr.msra.gmra.mrb[0].mxu0 %vm46_vm7, %v45_v47  ;;  %2780 = vmatmul.mubr.msk.f32.vlgmr.msra.gmra.mrb[0].mxu1 %vm46_vm7, %v45_v47 }
  0x9e   :  { %3000 = vmatpush3.bf16.msk.msra.mxu0 %vm3249_vm3, %v3162_v22  ;;  %3003 = vmatpush3.bf16.msk.msra.mxu1 %vm3256_vm6, %v3162_v22  ;;  %v2404_v52 = vmax.f32 %v3245_v17, %v2402_v50 }
  0x9f   :  { %2786 = vmatprep.mubr.msk.f32.mxu0 %vm3160_vm0, %v3161_v16  ;;  %2793 = vmatprep.mubr.msk.f32.mxu1 %vm3160_vm0, %v3161_v16 }
  0xa0   :  { %1929 = vrot.lane.b32.xlu0 %v3290_v49, %s3158_s18  ;;  %2090 = vrot.lane.b32.xlu1 %v2088_v48, %s3163_s0 }
  0xa1   :  { %3004 = vmatprep.subr.bf16.mxu0 %v3159_v13  ;;  %3007 = vmatprep.subr.bf16.mxu1 %v3159_v13 }
  0xa4   :  { %2248 = vrot.lane.b32.xlu0 %v2246_v51, %s3164_s19  ;;  %2406 = vrot.lane.b32.xlu1 %v2404_v52, %s3165_s20 }
  0xfa   :  { %v201_v53 = vpop.permute.xlu1 %200 }
  0xfb   :  { %2787 = vmatmul.mubr.msk.f32.vlgmr.msra.gmra.mrb[2].mxu0 %vm46_vm7, %v201_v53  ;;  %2794 = vmatmul.mubr.msk.f32.vlgmr.msra.gmra.mrb[2].mxu1 %vm46_vm7, %v201_v53 }
  0xfc   :  { %3006 = vmatpush3.bf16.msk.msra.mxu0 %vm3249_vm3, %v3162_v22  ;;  %3009 = vmatpush3.bf16.msk.msra.mxu1 %vm3256_vm6, %v3162_v22 }
  0xfd   :  { %2800 = vmatprep.mubr.msk.f32.mxu0 %vm3160_vm0, %v3161_v16  ;;  %2807 = vmatprep.mubr.msk.f32.mxu1 %vm3160_vm0, %v3161_v16 }
  0xfe   :  { %v359_v54 = vpop.permute.xlu0 %358  ;;  %3010 = vmatprep.subr.bf16.mxu0 %v3159_v13  ;;  %3013 = vmatprep.subr.bf16.mxu1 %v3159_v13  ;;  %v517_v55 = vpop.permute.xlu1 %516 }
  0xff   :  { %2801 = vmatmul.mubr.msk.f32.vlgmr.msra.gmra.mrb[4].mxu0 %vm46_vm7, %v359_v54  ;;  %2808 = vmatmul.mubr.msk.f32.vlgmr.msra.gmra.mrb[4].mxu1 %vm46_vm7, %v359_v54 }
 0x100   :  { %3012 = vmatpush3.bf16.msk.msra.mxu0 %vm3249_vm3, %v3162_v22  ;;  %3015 = vmatpush3.bf16.msk.msra.mxu1 %vm3256_vm6, %v3162_v22 }
 0x101   :  { %2814 = vmatprep.mubr.msk.f32.mxu0 %vm3160_vm0, %v3161_v16  ;;  %2821 = vmatprep.mubr.msk.f32.mxu1 %vm3160_vm0, %v3161_v16 }
 0x102   :  { %3016 = vmatprep.subr.bf16.mxu0 %v3159_v13  ;;  %3019 = vmatprep.subr.bf16.mxu1 %v3159_v13  ;;  %v670_v56 = vpop.permute.xlu0 %669  ;;  %v831_v58 = vpop.permute.xlu1 %830 }
 0x103   :  { %2815 = vmatmul.mubr.msk.f32.vlgmr.msra.gmra.mrb[6].mxu0 %vm46_vm7, %v517_v55  ;;  %2822 = vmatmul.mubr.msk.f32.vlgmr.msra.gmra.mrb[6].mxu1 %vm46_vm7, %v517_v55  ;;  %v672_v57 = vmax.f32 %v3269_v32, %v670_v56 }
 0x104   :  { %3018 = vmatpush3.bf16.msk.msra.mxu0 %vm3249_vm3, %v3162_v22  ;;  %3021 = vmatpush3.bf16.msk.msra.mxu1 %vm3256_vm6, %v3162_v22 }
 0x105   :  { %2828 = vmatprep.mubr.msk.f32.mxu0 %vm3160_vm0, %v3161_v16  ;;  %2835 = vmatprep.mubr.msk.f32.mxu1 %vm3160_vm0, %v3161_v16 }
 0x106   :  { %3022 = vmatprep.subr.bf16.mxu0 %v3159_v13  ;;  %3025 = vmatprep.subr.bf16.mxu1 %v3159_v13  ;;  %v989_v59 = vpop.permute.xlu0 %988  ;;  %v1147_v60 = vpop.permute.xlu1 %1146 }
 0x107   :  { %2829 = vmatmul.mubr.msk.f32.vlgmr.msra.gmra.mrb[8].mxu0 %vm46_vm7, %v672_v57  ;;  %2836 = vmatmul.mubr.msk.f32.vlgmr.msra.gmra.mrb[8].mxu1 %vm46_vm7, %v672_v57 }
 0x108   :  { %3024 = vmatpush3.bf16.msk.msra.mxu0 %vm3249_vm3, %v3162_v22  ;;  %3027 = vmatpush3.bf16.msk.msra.mxu1 %vm3256_vm6, %v3162_v22 }
 0x109   :  { %2842 = vmatprep.mubr.msk.f32.mxu0 %vm3160_vm0, %v3161_v16  ;;  %2849 = vmatprep.mubr.msk.f32.mxu1 %vm3160_vm0, %v3161_v16 }
 0x10a   :  { %3028 = vmatprep.subr.bf16.mxu0 %v3159_v13  ;;  %3031 = vmatprep.subr.bf16.mxu1 %v3159_v13  ;;  %v1300_v61 = vpop.permute.xlu0 %1299  ;;  %v1461_v63 = vpop.permute.xlu1 %1460 }
 0x10b   :  { %2843 = vmatmul.mubr.msk.f32.vlgmr.msra.gmra.mrb[10].mxu0 %vm46_vm7, %v831_v58  ;;  %2850 = vmatmul.mubr.msk.f32.vlgmr.msra.gmra.mrb[10].mxu1 %vm46_vm7, %v831_v58  ;;  %v1302_v62 = vmax.f32 %v3279_v40, %v1300_v61 }
 0x10c   :  { %3030 = vmatpush3.bf16.msk.msra.mxu0 %vm3249_vm3, %v3162_v22  ;;  %3033 = vmatpush3.bf16.msk.msra.mxu1 %vm3256_vm6, %v3162_v22 }
 0x10d   :  { %2856 = vmatprep.mubr.msk.f32.mxu0 %vm3160_vm0, %v3161_v16  ;;  %2863 = vmatprep.mubr.msk.f32.mxu1 %vm3160_vm0, %v3161_v16 }
 0x10e   :  { %3034 = vmatprep.subr.bf16.mxu0 %v3159_v13  ;;  %3037 = vmatprep.subr.bf16.mxu1 %v3159_v13  ;;  %v1619_v0 = vpop.permute.xlu0 %1618  ;;  %v1777_v1 = vpop.permute.xlu1 %1776 }
 0x10f   :  { %2857 = vmatmul.mubr.msk.f32.vlgmr.msra.gmra.mrb[12].mxu0 %vm46_vm7, %v989_v59  ;;  %2864 = vmatmul.mubr.msk.f32.vlgmr.msra.gmra.mrb[12].mxu1 %vm46_vm7, %v989_v59 }
 0x110   :  { %3036 = vmatpush3.bf16.msk.msra.mxu0 %vm3249_vm3, %v3162_v22  ;;  %3039 = vmatpush3.bf16.msk.msra.mxu1 %vm3256_vm6, %v3162_v22 }
 0x111   :  { %2870 = vmatprep.mubr.msk.f32.mxu0 %vm3160_vm0, %v3161_v16  ;;  %2877 = vmatprep.mubr.msk.f32.mxu1 %vm3160_vm0, %v3161_v16 }
 0x112   :  { %3040 = vmatprep.subr.bf16.mxu0 %v3159_v13  ;;  %3043 = vmatprep.subr.bf16.mxu1 %v3159_v13  ;;  %v1930_v2 = vpop.permute.xlu0 %1929  ;;  %v2091_v4 = vpop.permute.xlu1 %2090 }
 0x113   :  { %2871 = vmatmul.mubr.msk.f32.vlgmr.msra.gmra.mrb[14].mxu0 %vm46_vm7, %v1147_v60  ;;  %2878 = vmatmul.mubr.msk.f32.vlgmr.msra.gmra.mrb[14].mxu1 %vm46_vm7, %v1147_v60  ;;  %v1932_v3 = vmax.f32 %v3290_v49, %v1930_v2 }
 0x114   :  { %3042 = vmatpush3.bf16.msk.msra.mxu0 %vm3249_vm3, %v3162_v22  ;;  %3045 = vmatpush3.bf16.msk.msra.mxu1 %vm3256_vm6, %v3162_v22 }
 0x115   :  { %2884 = vmatprep.mubr.msk.f32.mxu0 %vm3160_vm0, %v3161_v16  ;;  %2891 = vmatprep.mubr.msk.f32.mxu1 %vm3160_vm0, %v3161_v16 }
 0x116   :  { %3046 = vmatprep.subr.bf16.mxu0 %v3159_v13  ;;  %3049 = vmatprep.subr.bf16.mxu1 %v3159_v13  ;;  %v2249_v5 = vpop.permute.xlu0 %2248  ;;  %v2407_v6 = vpop.permute.xlu1 %2406 }
 0x117   :  { %2885 = vmatmul.mubr.msk.f32.vlgmr.msra.gmra.mrb[16].mxu0 %vm46_vm7, %v1302_v62  ;;  %2892 = vmatmul.mubr.msk.f32.vlgmr.msra.gmra.mrb[16].mxu1 %vm46_vm7, %v1302_v62 }
 0x118   :  { %3048 = vmatpush3.bf16.msk.msra.mxu0 %vm3249_vm3, %v3162_v22  ;;  %3051 = vmatpush3.bf16.msk.msra.mxu1 %vm3256_vm6, %v3162_v22 }
 0x119   :  { %2898 = vmatprep.mubr.msk.f32.mxu0 %vm3160_vm0, %v3161_v16  ;;  %2905 = vmatprep.mubr.msk.f32.mxu1 %vm3160_vm0, %v3161_v16 }
 0x11a   :  { %3052 = vmatprep.subr.bf16.mxu0 %v3159_v13  ;;  %3055 = vmatprep.subr.bf16.mxu1 %v3159_v13 }
 0x11b   :  { %2899 = vmatmul.mubr.msk.f32.vlgmr.msra.gmra.mrb[18].mxu0 %vm46_vm7, %v1461_v63  ;;  %2906 = vmatmul.mubr.msk.f32.vlgmr.msra.gmra.mrb[18].mxu1 %vm46_vm7, %v1461_v63 }
 0x11c   :  { %3054 = vmatpush3.bf16.msk.msra.mxu0 %vm3249_vm3, %v3162_v22  ;;  %3057 = vmatpush3.bf16.msk.msra.mxu1 %vm3256_vm6, %v3162_v22 }
 0x11d   :  { %2912 = vmatprep.mubr.msk.f32.mxu0 %vm3160_vm0, %v3161_v16  ;;  %2919 = vmatprep.mubr.msk.f32.mxu1 %vm3160_vm0, %v3161_v16 }
 0x11e   :  { %3058 = vmatprep.subr.bf16.mxu0 %v3159_v13  ;;  %3061 = vmatprep.subr.bf16.mxu1 %v3159_v13 }
 0x11f   :  { %2913 = vmatmul.mubr.msk.f32.vlgmr.msra.gmra.mrb[20].mxu0 %vm46_vm7, %v1619_v0  ;;  %2920 = vmatmul.mubr.msk.f32.vlgmr.msra.gmra.mrb[20].mxu1 %vm46_vm7, %v1619_v0 }
 0x120   :  { %3060 = vmatpush3.bf16.msk.msra.mxu0 %vm3249_vm3, %v3162_v22  ;;  %3063 = vmatpush3.bf16.msk.msra.mxu1 %vm3256_vm6, %v3162_v22 }
 0x121   :  { %2926 = vmatprep.mubr.msk.f32.mxu0 %vm3160_vm0, %v3161_v16  ;;  %2933 = vmatprep.mubr.msk.f32.mxu1 %vm3160_vm0, %v3161_v16 }
 0x122   :  { %3064 = vmatprep.subr.bf16.mxu0 %v3159_v13  ;;  %3067 = vmatprep.subr.bf16.mxu1 %v3159_v13 }
 0x123   :  { %2927 = vmatmul.mubr.msk.f32.vlgmr.msra.gmra.mrb[22].mxu0 %vm46_vm7, %v1777_v1  ;;  %2934 = vmatmul.mubr.msk.f32.vlgmr.msra.gmra.mrb[22].mxu1 %vm46_vm7, %v1777_v1 }
 0x124   :  { %3066 = vmatpush3.bf16.msk.msra.mxu0 %vm3249_vm3, %v3162_v22  ;;  %3069 = vmatpush3.bf16.msk.msra.mxu1 %vm3256_vm6, %v3162_v22 }
 0x125   :  { %2940 = vmatprep.mubr.msk.f32.mxu0 %vm3160_vm0, %v3161_v16  ;;  %2947 = vmatprep.mubr.msk.f32.mxu1 %vm3160_vm0, %v3161_v16 }
 0x126   :  { %3070 = vmatprep.subr.bf16.mxu0 %v3159_v13  ;;  %3073 = vmatprep.subr.bf16.mxu1 %v3159_v13 }
 0x127   :  { %2941 = vmatmul.mubr.msk.f32.vlgmr.msra.gmra.mrb[24].mxu0 %vm46_vm7, %v1932_v3  ;;  %2948 = vmatmul.mubr.msk.f32.vlgmr.msra.gmra.mrb[24].mxu1 %vm46_vm7, %v1932_v3 }
 0x128   :  { %3072 = vmatpush3.bf16.msk.msra.mxu0 %vm3249_vm3, %v3162_v22  ;;  %3075 = vmatpush3.bf16.msk.msra.mxu1 %vm3256_vm6, %v3162_v22 }
 0x129   :  { %2954 = vmatprep.mubr.msk.f32.mxu0 %vm3160_vm0, %v3161_v16  ;;  %2961 = vmatprep.mubr.msk.f32.mxu1 %vm3160_vm0, %v3161_v16 }
 0x12a   :  { %3076 = vmatprep.subr.bf16.mxu0 %v3159_v13  ;;  %3079 = vmatprep.subr.bf16.mxu1 %v3159_v13 }
 0x12b   :  { %2955 = vmatmul.mubr.msk.f32.vlgmr.msra.gmra.mrb[26].mxu0 %vm46_vm7, %v2091_v4  ;;  %2962 = vmatmul.mubr.msk.f32.vlgmr.msra.gmra.mrb[26].mxu1 %vm46_vm7, %v2091_v4 }
 0x12c   :  { %3078 = vmatpush3.bf16.msk.msra.mxu0 %vm3249_vm3, %v3162_v22  ;;  %3081 = vmatpush3.bf16.msk.msra.mxu1 %vm3256_vm6, %v3162_v22 }
 0x12d   :  { %2968 = vmatprep.mubr.msk.f32.mxu0 %vm3160_vm0, %v3161_v16  ;;  %2975 = vmatprep.mubr.msk.f32.mxu1 %vm3160_vm0, %v3161_v16 }
 0x12e   :  { %3082 = vmatprep.subr.bf16.mxu0 %v3159_v13  ;;  %3085 = vmatprep.subr.bf16.mxu1 %v3159_v13 }
 0x12f   :  { %2969 = vmatmul.mubr.msk.f32.vlgmr.msra.gmra.mrb[28].mxu0 %vm46_vm7, %v2249_v5  ;;  %2976 = vmatmul.mubr.msk.f32.vlgmr.msra.gmra.mrb[28].mxu1 %vm46_vm7, %v2249_v5 }
 0x130   :  { %3084 = vmatpush3.bf16.msk.msra.mxu0 %vm3249_vm3, %v3162_v22  ;;  %3087 = vmatpush3.bf16.msk.msra.mxu1 %vm3256_vm6, %v3162_v22  ;;  %vm1925_vm3 = vcmask 782016   ;;  %vm2397_vm6 = vcmask 978816  }
 0x131   :  { %2982 = vmatprep.mubr.msk.f32.mxu0 %vm3160_vm0, %v3161_v16  ;;  %2989 = vmatprep.mubr.msk.f32.mxu1 %vm3160_vm0, %v3161_v16  ;;  %vm1451_vm0 = vcmask 585216  }
 0x133   :  { %2983 = vmatmul.mubr.msk.f32.vlgmr.msra.gmra.mrb[30].mxu0 %vm46_vm7, %v2407_v6  ;;  %2990 = vmatmul.mubr.msk.f32.vlgmr.msra.gmra.mrb[30].mxu1 %vm46_vm7, %v2407_v6  ;;  %vm2555_vm7 = vcmask 1044416  }
 0x170   :  { %v116_v7 = vpop.f32.mrb[0].mxu0  ;;  %v186_v8 = vpop.f32.mrb[0].mxu1 }
 0x171   :  { %v190_v9 = vmax.f32 %v116_v7, %v186_v8  ;;  %v2774_v10 = vpop.f32.mrb[1].mxu0  ;;  %v2781_v11 = vpop.f32.mrb[1].mxu1 }
 0x173   :  { %192 = vst.msk [vmem:[#allocation5] sm:$0xf] %vm191_vm8, %v190_v9 }
 0x1ce   :  { %v270_v12 = vpop.f32.mrb[2].mxu0  ;;  %v340_v13 = vpop.f32.mrb[2].mxu1 }
 0x1cf   :  { %v344_v14 = vmax.f32 %v270_v12, %v340_v13  ;;  %v2788_v15 = vpop.f32.mrb[3].mxu0  ;;  %v2795_v17 = vpop.f32.mrb[3].mxu1 }
 0x1d1   :  { %346 = vrot.lane.b32.xlu0 %v344_v14, %s3166_s21 }
 0x1d2   :  { %v428_v18 = vpop.f32.mrb[4].mxu0  ;;  %v498_v16 = vpop.f32.mrb[4].mxu1 }
 0x1d3   :  { %v502_v19 = vmax.f32 %v428_v18, %v498_v16  ;;  %v2802_v20 = vpop.f32.mrb[5].mxu0  ;;  %v2809_v21 = vpop.f32.mrb[5].mxu1 }
 0x1d5   :  { %504 = vrot.lane.b32.xlu1 %v502_v19, %s3167_s22 }
 0x1d6   :  { %v586_v22 = vpop.f32.mrb[6].mxu0  ;;  %v656_v23 = vpop.f32.mrb[6].mxu1 }
 0x1d7   :  { %v660_v24 = vmax.f32 %v586_v22, %v656_v23  ;;  %v2816_v25 = vpop.f32.mrb[7].mxu0  ;;  %v2823_v26 = vpop.f32.mrb[7].mxu1 }
 0x1d9   :  { %662 = vrot.lane.b32.xlu0 %v660_v24, %s3168_s23 }
 0x1da   :  { %v742_v27 = vpop.f32.mrb[8].mxu0  ;;  %v812_v28 = vpop.f32.mrb[8].mxu1 }
 0x1db   :  { %v816_v29 = vmax.f32 %v742_v27, %v812_v28  ;;  %v2830_v30 = vpop.f32.mrb[9].mxu0  ;;  %v2837_v31 = vpop.f32.mrb[9].mxu1 }
 0x1dd   :  { %818 = vrot.lane.b32.xlu1 %v816_v29, %s3165_s20 }
 0x1de   :  { %v900_v32 = vpop.f32.mrb[10].mxu0  ;;  %v970_v33 = vpop.f32.mrb[10].mxu1 }
 0x1df   :  { %v974_v34 = vmax.f32 %v900_v32, %v970_v33  ;;  %v2844_v35 = vpop.f32.mrb[11].mxu0  ;;  %v2851_v36 = vpop.f32.mrb[11].mxu1 }
 0x1e1   :  { %976 = vrot.lane.b32.xlu0 %v974_v34, %s3169_s24 }
 0x1e2   :  { %v1058_v37 = vpop.f32.mrb[12].mxu0  ;;  %v1128_v38 = vpop.f32.mrb[12].mxu1 }
 0x1e3   :  { %v1132_v39 = vmax.f32 %v1058_v37, %v1128_v38  ;;  %v2858_v40 = vpop.f32.mrb[13].mxu0  ;;  %v2865_v41 = vpop.f32.mrb[13].mxu1 }
 0x1e5   :  { %1134 = vrot.lane.b32.xlu1 %v1132_v39, %s3170_s25 }
 0x1e6   :  { %v1216_v42 = vpop.f32.mrb[14].mxu0  ;;  %v1286_v43 = vpop.f32.mrb[14].mxu1 }
 0x1e7   :  { %v1290_v44 = vmax.f32 %v1216_v42, %v1286_v43  ;;  %v2872_v45 = vpop.f32.mrb[15].mxu0  ;;  %v2879_v46 = vpop.f32.mrb[15].mxu1 }
 0x1e9   :  { %1292 = vrot.lane.b32.xlu0 %v1290_v44, %s3171_s26 }
 0x1ea   :  { %v1372_v47 = vpop.f32.mrb[16].mxu0  ;;  %v1442_v48 = vpop.f32.mrb[16].mxu1 }
 0x1eb   :  { %v1446_v49 = vmax.f32 %v1372_v47, %v1442_v48  ;;  %v2886_v50 = vpop.f32.mrb[17].mxu0  ;;  %v2893_v51 = vpop.f32.mrb[17].mxu1 }
 0x1ed   :  { %1448 = vrot.lane.b32.xlu1 %v1446_v49, %s3164_s19 }
 0x1ee   :  { %v1530_v52 = vpop.f32.mrb[18].mxu0  ;;  %v1600_v53 = vpop.f32.mrb[18].mxu1 }
 0x1ef   :  { %v1604_v54 = vmax.f32 %v1530_v52, %v1600_v53  ;;  %v2900_v55 = vpop.f32.mrb[19].mxu0  ;;  %v2907_v56 = vpop.f32.mrb[19].mxu1 }
 0x1f1   :  { %1606 = vrot.lane.b32.xlu0 %v1604_v54, %s3172_s27 }
 0x1f2   :  { %v1688_v57 = vpop.f32.mrb[20].mxu0  ;;  %v1758_v58 = vpop.f32.mrb[20].mxu1 }
 0x1f3   :  { %v1762_v59 = vmax.f32 %v1688_v57, %v1758_v58  ;;  %v2914_v60 = vpop.f32.mrb[21].mxu0  ;;  %v2921_v61 = vpop.f32.mrb[21].mxu1 }
 0x1f5   :  { %1764 = vrot.lane.b32.xlu1 %v1762_v59, %s3173_s28 }
 0x1f6   :  { %v1846_v62 = vpop.f32.mrb[22].mxu0  ;;  %v1916_v63 = vpop.f32.mrb[22].mxu1 }
 0x1f7   :  { %v1920_v0 = vmax.f32 %v1846_v62, %v1916_v63  ;;  %v2928_v1 = vpop.f32.mrb[23].mxu0  ;;  %v2935_v2 = vpop.f32.mrb[23].mxu1 }
 0x1f9   :  { %1922 = vrot.lane.b32.xlu0 %v1920_v0, %s3174_s29 }
 0x1fa   :  { %v2002_v3 = vpop.f32.mrb[24].mxu0  ;;  %v2072_v4 = vpop.f32.mrb[24].mxu1 }
 0x1fb   :  { %v2076_v5 = vmax.f32 %v2002_v3, %v2072_v4  ;;  %v2942_v6 = vpop.f32.mrb[25].mxu0  ;;  %v2949_v7 = vpop.f32.mrb[25].mxu1 }
 0x1fd   :  { %2078 = vrot.lane.b32.xlu1 %v2076_v5, %s3163_s0 }
 0x1fe   :  { %v2160_v8 = vpop.f32.mrb[26].mxu0  ;;  %v2230_v9 = vpop.f32.mrb[26].mxu1 }
 0x1ff   :  { %v2234_v10 = vmax.f32 %v2160_v8, %v2230_v9  ;;  %v2956_v11 = vpop.f32.mrb[27].mxu0  ;;  %v2963_v12 = vpop.f32.mrb[27].mxu1 }
 0x201   :  { %2236 = vrot.lane.b32.xlu0 %v2234_v10, %s3175_s30 }
 0x202   :  { %v2318_v13 = vpop.f32.mrb[28].mxu0  ;;  %v2388_v14 = vpop.f32.mrb[28].mxu1 }
 0x203   :  { %v2392_v15 = vmax.f32 %v2318_v13, %v2388_v14  ;;  %v2970_v17 = vpop.f32.mrb[29].mxu0  ;;  %v2977_v18 = vpop.f32.mrb[29].mxu1 }
 0x205   :  { %2394 = vrot.lane.b32.xlu1 %v2392_v15, %s3158_s18 }
 0x206   :  { %v2476_v16 = vpop.f32.mrb[30].mxu0  ;;  %v2546_v19 = vpop.f32.mrb[30].mxu1 }
 0x207   :  { %v2550_v20 = vmax.f32 %v2476_v16, %v2546_v19  ;;  %v2984_v21 = vpop.f32.mrb[31].mxu0  ;;  %v2991_v22 = vpop.f32.mrb[31].mxu1 }
 0x209   :  { %2552 = vrot.lane.b32.xlu0 %v2550_v20, %s3176_s2 }
 0x243   :  { %v347_v23 = vpop.permute.xlu0 %346 }
 0x244   :  { %350 = vst.msk [vmem:[#allocation5] sm:$0xf] %vm349_vm9, %v347_v23 }
 0x247   :  { %v505_v24 = vpop.permute.xlu1 %504 }
 0x248   :  { %508 = vst.msk [vmem:[#allocation5] sm:$0xf] %vm507_vm10, %v505_v24 }
 0x24b   :  { %v663_v25 = vpop.permute.xlu0 %662 }
 0x24c   :  { %666 = vst.msk [vmem:[#allocation5] sm:$0xf] %vm665_vm11, %v663_v25 }
 0x24f   :  { %v819_v26 = vpop.permute.xlu1 %818 }
 0x250   :  { %822 = vst.msk [vmem:[#allocation5] sm:$0xf] %vm821_vm12, %v819_v26 }
 0x253   :  { %v977_v27 = vpop.permute.xlu0 %976 }
 0x254   :  { %980 = vst.msk [vmem:[#allocation5] sm:$0xf] %vm979_vm13, %v977_v27 }
 0x257   :  { %v1135_v28 = vpop.permute.xlu1 %1134 }
 0x258   :  { %1138 = vst.msk [vmem:[#allocation5] sm:$0xf] %vm1137_vm14, %v1135_v28 }
 0x25b   :  { %v1293_v29 = vpop.permute.xlu0 %1292 }
 0x25c   :  { %1296 = vst.msk [vmem:[#allocation5] sm:$0xf] %vm1295_vm15, %v1293_v29 }
 0x25f   :  { %v1449_v30 = vpop.permute.xlu1 %1448 }
 0x260   :  { %1452 = vst.msk [vmem:[#allocation5] sm:$0xf] %vm1451_vm0, %v1449_v30 }
 0x263   :  { %v1607_v31 = vpop.permute.xlu0 %1606 }
 0x264   :  { %1610 = vst.msk [vmem:[#allocation5] sm:$0xf] %vm1609_vm1, %v1607_v31 }
 0x267   :  { %v1765_v32 = vpop.permute.xlu1 %1764 }
 0x268   :  { %1768 = vst.msk [vmem:[#allocation5] sm:$0xf] %vm1767_vm2, %v1765_v32 }
 0x26b   :  { %v1923_v33 = vpop.permute.xlu0 %1922 }
 0x26c   :  { %1926 = vst.msk [vmem:[#allocation5] sm:$0xf] %vm1925_vm3, %v1923_v33 }
 0x26f   :  { %v2079_v34 = vpop.permute.xlu1 %2078 }
 0x270   :  { %2082 = vst.msk [vmem:[#allocation5] sm:$0xf] %vm2081_vm4, %v2079_v34 }
 0x273   :  { %v2237_v35 = vpop.permute.xlu0 %2236 }
 0x274   :  { %2240 = vst.msk [vmem:[#allocation5] sm:$0xf] %vm2239_vm5, %v2237_v35 }
 0x277   :  { %v2395_v36 = vpop.permute.xlu1 %2394 }
 0x278   :  { %2398 = vst.msk [vmem:[#allocation5] sm:$0xf] %vm2397_vm6, %v2395_v36 }
 0x27b   :  { %v2553_v37 = vpop.permute.xlu0 %2552 }
 0x27c   :  { %2556 = vst.msk [vmem:[#allocation5] sm:$0xf] %vm2555_vm7, %v2553_v37 }
 0x27d   :  { %3142 = shalt.err (!%p3139_p12)
}
 0x27e   :  { %s3143_s8 = scalar_lea.hbm %s3529_s1, 64 }
 0x27f   :  { %p3144_p13 = scmp.ne.s32.totalorder %s3529_s1, %s3143_s8  ;;  %p3147_p0 = scmp.lt.u32.totalorder %s3143_s8, %s3529_s1 }
 0x281   :  { %p3149_p1 = pnand %p3147_p0, %p3144_p13 }
 0x283   :  { %3152 = shalt.err (!%p3149_p1)
}
 0x284   :  { %2566 = dma.vmem_to_hbm [thread:$0]  %s2564_s4, 64, %s3529_s1, [#allocation4]  }
 0x285   :  { %3155 = dma.done.wait [#allocation4], 64  }
 0x286   :  { %3156 = vsyncadd [#allocation4], 4294967232 }
 0x287   :  { %2570 = vsyncpa [#allocation3], 1 }
 0x288   :  { %2571 = vsyncpa [#allocation4], 1 }

</bundles_post_ra>
